<compile_context>
chip_gen: v5e
topology: v5e:2x2
jax: 0.10.0
libtpu: 0.0.40
codegen_flags: <defaults>
</compile_context>

<pallas_src>
from functools import reduce
import operator
from typing import Dict, Sequence

import jax
import jax.numpy as jnp
from jax.experimental import pallas as pl
from jax.experimental.pallas import tpu as pltpu


def _prod(xs):
    return reduce(operator.mul, xs, 1)


# A column slice is "DMA friendly" if its byte width is a multiple of a full
# 128-lane 32-bit tile row: 512 B (== 128 f32 / 256 bf16 / 512 int8 elements).
_LANE_BYTES = 512

# Staged-path VMEM budget for in-flight buffers (2x double-buffered inputs +
# 2x output).  Sized for v7x's 64 MiB VMEM with plenty of headroom.
_STAGED_VMEM_BUDGET = 16 << 20
_STAGED_VMEM_LIMIT = 48 << 20


# --------------------------------------------------------------------------
# Path 1: direct HBM->HBM DMA concat (aligned widths).
# --------------------------------------------------------------------------
def _dma_concat_2d(xs_2d, widths, m, n_total, dtype, itemsize):
    offsets = []
    off = 0
    for w in widths:
        offsets.append(off)
        off += w
    n_in = len(widths)
    total_bytes = m * n_total * itemsize

    # Row-split grid: marked "parallel" so on v7x both TensorCores issue DMA
    # descriptors (and more descriptors are in flight per input); on v5e/v6e
    # it is a short serial loop over a bandwidth-bound copy (negligible cost).
    n_splits = 1
    for cand, min_bytes in ((4, 8 << 20), (2, 1 << 20)):
        if total_bytes >= min_bytes and m % cand == 0:
            n_splits = cand
            break
    rows_per = m // n_splits

    def kernel(*refs):
        # refs = (in_hbm_refs..., out_hbm_ref, dma_sem_array)
        in_refs = refs[:n_in]
        out_ref = refs[n_in]
        sem = refs[n_in + 1]

        row0 = pl.multiple_of(pl.program_id(0) * rows_per, rows_per)
        copies = []
        for i, (o, w) in enumerate(zip(offsets, widths)):
            # Static column slice -> strided-destination DMA descriptor.
            cp = pltpu.make_async_copy(
                in_refs[i].at[pl.ds(row0, rows_per), :],
                out_ref.at[pl.ds(row0, rows_per), o:o + w],
                sem.at[i])
            cp.start()
            copies.append(cp)
        # All DMAs for this row chunk are in flight concurrently.
        for cp in copies:
            cp.wait()

    return pl.pallas_call(
        kernel,
        out_shape=jax.ShapeDtypeStruct((m, n_total), dtype),
        grid=(n_splits,),
        # Raw HBM refs: no BlockSpec tiling, no VMEM round-trip.
        in_specs=[pl.BlockSpec(memory_space=pl.ANY) for _ in widths],
        out_specs=pl.BlockSpec(memory_space=pl.ANY),
        scratch_shapes=[pltpu.SemaphoreType.DMA((n_in,))],
        compiler_params=pltpu.CompilerParams(
            dimension_semantics=("parallel",)),
        # Pure bandwidth op: read everything once, write everything once.
        cost_estimate=pl.CostEstimate(
            flops=0, transcendentals=0, bytes_accessed=2 * total_bytes),
    )(*xs_2d)


# --------------------------------------------------------------------------
# Path 2: VMEM-staged concat (unaligned / narrow widths).
# --------------------------------------------------------------------------
def _staged_concat_2d(xs_2d, widths, m, n_total, dtype, itemsize):
    n_in = len(widths)
    total_bytes = m * n_total * itemsize

    # v7x-aware tile sizing: ~2x double-buffered inputs + 2x output buffers
    # per grid step must fit comfortably in 64 MiB VMEM.
    per_row_bytes = max(1, 4 * n_total * itemsize)
    tile_m = _STAGED_VMEM_BUDGET // per_row_bytes
    if tile_m >= m or m <= 32:
        tile_m = m                       # full dim -> always a legal block
    else:
        # Multiple of 32 sublanes covers f32/bf16/int8 packing granularity.
        tile_m = max(32, (tile_m // 32) * 32)
    grid = (pl.cdiv(m, tile_m),)

    def kernel(*refs):
        in_refs = refs[:n_in]
        out_ref = refs[n_in]
        # Many narrow inputs -> one wide lane-dense store per row tile.
        out_ref[...] = jnp.concatenate([r[...] for r in in_refs], axis=-1)

    return pl.pallas_call(
        kernel,
        out_shape=jax.ShapeDtypeStruct((m, n_total), dtype),
        grid=grid,
        in_specs=[pl.BlockSpec((tile_m, w), lambda i: (i, 0)) for w in widths],
        out_specs=pl.BlockSpec((tile_m, n_total), lambda i: (i, 0)),
        compiler_params=pltpu.CompilerParams(
            dimension_semantics=("parallel",),
            vmem_limit_bytes=_STAGED_VMEM_LIMIT),
        cost_estimate=pl.CostEstimate(
            flops=0, transcendentals=0, bytes_accessed=2 * total_bytes),
    )(*xs_2d)


def _pallas_concat_2d(xs_2d):
    """Concatenate a list of [M, Ni] arrays along axis -1."""
    m = xs_2d[0].shape[0]
    widths = [int(x.shape[1]) for x in xs_2d]
    n_total = sum(widths)
    dtype = xs_2d[0].dtype
    itemsize = jnp.dtype(dtype).itemsize

    aligned = all(w > 0 and (w * itemsize) % _LANE_BYTES == 0 for w in widths)
    if aligned:
        return _dma_concat_2d(xs_2d, widths, m, n_total, dtype, itemsize)
    return _staged_concat_2d(xs_2d, widths, m, n_total, dtype, itemsize)


class CatObservations:
    """JAX/Pallas port of the PyTorch CatObservations module."""

    def __init__(self, ordered_uuids: Sequence[str], dim: int):
        assert len(ordered_uuids) != 0
        self.ordered_uuids = tuple(ordered_uuids)
        self.dim = dim

    def __call__(self, observations: Dict[str, jax.Array]) -> jax.Array:
        if len(self.ordered_uuids) == 1:
            return observations[self.ordered_uuids[0]]

        xs = [observations[uuid] for uuid in self.ordered_uuids]

        ref_shape = xs[0].shape
        ndim = len(ref_shape)
        dim = self.dim % ndim

        # torch.cat-style validation: same rank, same shape off the cat axis.
        off_axis_ref = ref_shape[:dim] + ref_shape[dim + 1:]
        for uuid, x in zip(self.ordered_uuids, xs):
            if len(x.shape) != ndim or (
                    x.shape[:dim] + x.shape[dim + 1:] != off_axis_ref):
                raise ValueError(
                    f"CatObservations: shape mismatch for '{uuid}': "
                    f"{x.shape} vs {ref_shape} (cat dim={dim})")

        # torch.cat performs standard dtype promotion; do the same.
        out_dtype = jnp.result_type(*xs)
        xs = [x.astype(out_dtype) for x in xs]

        cat_size = sum(x.shape[dim] for x in xs)
        out_shape = ref_shape[:dim] + (cat_size,) + ref_shape[dim + 1:]

        # torch.cat tolerates empty tensors: drop zero-width inputs.
        xs = [x for x in xs if x.shape[dim] > 0]
        if not xs:
            return jnp.zeros(out_shape, out_dtype)
        if len(xs) == 1:
            return xs[0]

        lead = _prod(ref_shape[:dim])          # same for all inputs
        trail = _prod(ref_shape[dim + 1:])     # same for all inputs
        if lead == 0 or trail == 0:
            return jnp.zeros(out_shape, out_dtype)

        # Collapse to 2D so the cat axis becomes the contiguous last axis.
        # Free view for default row-major layouts; a transposed/non-default
        # layout would make XLA insert a physical copy here.
        # TODO(synk): assert/force default layouts on inputs to guarantee the
        # reshape stays a view and HBM traffic is not silently doubled.
        xs_2d = [x.reshape(lead, x.shape[dim] * trail) for x in xs]

        out_2d = _pallas_concat_2d(xs_2d)
        return out_2d.reshape(out_shape)


if __name__ == "__main__":
    key = jax.random.PRNGKey(0)
    keys = jax.random.split(key, 12)

    # --- 1. NCHW observations, concat along channels (dim=1): aligned
    #        per-row chunks -> direct HBM->HBM DMA path. ---------------------
    observations = {
        "rgb": jax.random.normal(keys[0], (2, 3, 16, 16), dtype=jnp.float32),
        "depth": jax.random.normal(keys[1], (2, 1, 16, 16), dtype=jnp.float32),
        "goal": jax.random.normal(keys[2], (2, 4, 16, 16), dtype=jnp.float32),
    }
    model = CatObservations(ordered_uuids=["rgb", "depth", "goal"], dim=1)
    out = jax.block_until_ready(model(observations))
    ref = jnp.concatenate(
        [observations[u] for u in ["rgb", "depth", "goal"]], axis=1)
    assert out.shape == (2, 8, 16, 16), out.shape
    assert jnp.array_equal(out, ref), "mismatch vs reference concat (dim=1)"

    # --- 2. [B, T, D] features, concat along last dim: aligned -> DMA path. -
    feats = {
        "a": jax.random.normal(keys[3], (2, 8, 128), dtype=jnp.float32),
        "b": jax.random.normal(keys[4], (2, 8, 256), dtype=jnp.float32),
    }
    out_feat = jax.block_until_ready(
        CatObservations(ordered_uuids=["a", "b"], dim=-1)(feats))
    ref_feat = jnp.concatenate([feats["a"], feats["b"]], axis=-1)
    assert out_feat.shape == (2, 8, 384), out_feat.shape
    assert jnp.array_equal(out_feat, ref_feat), "mismatch (dim=-1 aligned)"

    # --- 3. Tiny unaligned sensor vectors (GPS/compass) -> staged path. ----
    sensors = {
        "gps": jax.random.normal(keys[5], (2, 3), dtype=jnp.float32),
        "compass": jax.random.normal(keys[6], (2, 1), dtype=jnp.float32),
        "feat": jax.random.normal(keys[7], (2, 32), dtype=jnp.float32),
    }
    out_s = jax.block_until_ready(
        CatObservations(ordered_uuids=["gps", "compass", "feat"], dim=-1)(sensors))
    ref_s = jnp.concatenate(
        [sensors[u] for u in ["gps", "compass", "feat"]], axis=-1)
    assert out_s.shape == (2, 36), out_s.shape
    assert jnp.array_equal(out_s, ref_s), "mismatch (unaligned staged path)"

    # --- 4. bf16 with odd widths -> staged path (sub-32-bit dtype). --------
    bf = {
        "x": jax.random.normal(keys[8], (4, 8, 40), dtype=jnp.bfloat16),
        "y": jax.random.normal(keys[9], (4, 8, 24), dtype=jnp.bfloat16),
    }
    out_bf = jax.block_until_ready(
        CatObservations(ordered_uuids=["x", "y"], dim=2)(bf))
    ref_bf = jnp.concatenate([bf["x"], bf["y"]], axis=2)
    assert out_bf.shape == (4, 8, 64), out_bf.shape
    assert jnp.array_equal(out_bf, ref_bf), "mismatch (bf16 staged path)"

    # --- 5. Mixed dtypes (int32 + float32) -> promotion + staged path. -----
    mix = {
        "i": jax.random.randint(keys[10], (2, 4), 0, 10, dtype=jnp.int32),
        "f": jax.random.normal(keys[11], (2, 4), dtype=jnp.float32),
    }
    out_mix = jax.block_until_ready(
        CatObservations(ordered_uuids=["i", "f"], dim=-1)(mix))
    ref_mix = jnp.concatenate(
        [mix["i"].astype(jnp.float32), mix["f"]], axis=-1)
    assert out_mix.dtype == jnp.float32
    assert jnp.array_equal(out_mix, ref_mix), "mismatch (dtype promotion)"

    # --- 6. Larger aligned images -> DMA path with 2-way parallel row split
    #        (exercises the multi-TC / multi-descriptor grid). --------------
    big = {
        "rgb": jax.random.normal(keys[0], (4, 16, 64, 64), dtype=jnp.float32),
        "depth": jax.random.normal(keys[1], (4, 8, 64, 64), dtype=jnp.float32),
    }
    out_big = jax.block_until_ready(
        CatObservations(ordered_uuids=["rgb", "depth"], dim=1)(big))
    ref_big = jnp.concatenate([big["rgb"], big["depth"]], axis=1)
    assert out_big.shape == (4, 24, 64, 64), out_big.shape
    assert jnp.array_equal(out_big, ref_big), "mismatch (row-split DMA path)"

    # --- 7. Single-uuid path returns the tensor unchanged (as in PyTorch). -
    single = jax.block_until_ready(
        CatObservations(ordered_uuids=["rgb"], dim=1)(observations))
    assert jnp.array_equal(single, observations["rgb"])

    print("KERNEL_OK")
</pallas_src>

<mosaic_0001>
module attributes {stable_mosaic.version = 11 : i64} {
  func.func @kernel(%arg0: i32, %arg1: memref<2x768xf32, #tpu.memory_space<any>>, %arg2: memref<2x256xf32, #tpu.memory_space<any>>, %arg3: memref<2x1024xf32, #tpu.memory_space<any>>, %arg4: memref<2x2048xf32, #tpu.memory_space<any>>, %arg5: memref<3x!tpu.dma_semaphore, #tpu.memory_space<semaphore_mem>>) attributes {dimension_semantics = [#tpu.dimension_semantics<parallel>], iteration_bounds = array<i64: 1>, scalar_prefetch = 0 : i64, scratch_operands = 1 : i64, tpu.core_type = #tpu.core_type<tc>, window_params = [{}, {}, {}, {}]} {
    %c2_i32 = arith.constant 2 : i32
    %0 = arith.muli %arg0, %c2_i32 : i32
    %1 = tpu.assume_multiple %0, 2 : i32
    %c0_i32 = arith.constant 0 : i32
    %c0_i32_0 = arith.constant 0 : i32
    %2 = tpu.memref_slice %arg1[%1, %c0_i32_0] : memref<2x768xf32, #tpu.memory_space<any>> -> memref<2x768xf32, #tpu.memory_space<any>>
    %c0_i32_1 = arith.constant 0 : i32
    %3 = tpu.memref_slice %arg4[%1, %c0_i32_1] : memref<2x2048xf32, #tpu.memory_space<any>> -> memref<2x768xf32, #tpu.memory_space<any>>
    %4 = tpu.memref_slice %arg5[%c0_i32] : memref<3x!tpu.dma_semaphore, #tpu.memory_space<semaphore_mem>> -> memref<1x!tpu.dma_semaphore, #tpu.memory_space<semaphore_mem>>
    %5 = tpu.memref_squeeze %4 : memref<1x!tpu.dma_semaphore, #tpu.memory_space<semaphore_mem>> -> memref<!tpu.dma_semaphore, #tpu.memory_space<semaphore_mem>>
    tpu.enqueue_dma source(%2 : memref<2x768xf32, #tpu.memory_space<any>>) target(%3 : memref<2x768xf32, #tpu.memory_space<any>>) target_semaphore(%5 : memref<!tpu.dma_semaphore, #tpu.memory_space<semaphore_mem>>)
    %c1_i32 = arith.constant 1 : i32
    %c0_i32_2 = arith.constant 0 : i32
    %6 = tpu.memref_slice %arg2[%1, %c0_i32_2] : memref<2x256xf32, #tpu.memory_space<any>> -> memref<2x256xf32, #tpu.memory_space<any>>
    %c768_i32 = arith.constant 768 : i32
    %7 = tpu.memref_slice %arg4[%1, %c768_i32] : memref<2x2048xf32, #tpu.memory_space<any>> -> memref<2x256xf32, #tpu.memory_space<any>>
    %8 = tpu.memref_slice %arg5[%c1_i32] : memref<3x!tpu.dma_semaphore, #tpu.memory_space<semaphore_mem>> -> memref<1x!tpu.dma_semaphore, #tpu.memory_space<semaphore_mem>>
    %9 = tpu.memref_squeeze %8 : memref<1x!tpu.dma_semaphore, #tpu.memory_space<semaphore_mem>> -> memref<!tpu.dma_semaphore, #tpu.memory_space<semaphore_mem>>
    tpu.enqueue_dma source(%6 : memref<2x256xf32, #tpu.memory_space<any>>) target(%7 : memref<2x256xf32, #tpu.memory_space<any>>) target_semaphore(%9 : memref<!tpu.dma_semaphore, #tpu.memory_space<semaphore_mem>>)
    %c2_i32_3 = arith.constant 2 : i32
    %c0_i32_4 = arith.constant 0 : i32
    %10 = tpu.memref_slice %arg3[%1, %c0_i32_4] : memref<2x1024xf32, #tpu.memory_space<any>> -> memref<2x1024xf32, #tpu.memory_space<any>>
    %c1024_i32 = arith.constant 1024 : i32
    %11 = tpu.memref_slice %arg4[%1, %c1024_i32] : memref<2x2048xf32, #tpu.memory_space<any>> -> memref<2x1024xf32, #tpu.memory_space<any>>
    %12 = tpu.memref_slice %arg5[%c2_i32_3] : memref<3x!tpu.dma_semaphore, #tpu.memory_space<semaphore_mem>> -> memref<1x!tpu.dma_semaphore, #tpu.memory_space<semaphore_mem>>
    %13 = tpu.memref_squeeze %12 : memref<1x!tpu.dma_semaphore, #tpu.memory_space<semaphore_mem>> -> memref<!tpu.dma_semaphore, #tpu.memory_space<semaphore_mem>>
    tpu.enqueue_dma source(%10 : memref<2x1024xf32, #tpu.memory_space<any>>) target(%11 : memref<2x1024xf32, #tpu.memory_space<any>>) target_semaphore(%13 : memref<!tpu.dma_semaphore, #tpu.memory_space<semaphore_mem>>)
    %c0_i32_5 = arith.constant 0 : i32
    %c0_i32_6 = arith.constant 0 : i32
    %14 = tpu.memref_slice %arg1[%1, %c0_i32_6] : memref<2x768xf32, #tpu.memory_space<any>> -> memref<2x768xf32, #tpu.memory_space<any>>
    %c0_i32_7 = arith.constant 0 : i32
    %15 = tpu.memref_slice %arg4[%1, %c0_i32_7] : memref<2x2048xf32, #tpu.memory_space<any>> -> memref<2x768xf32, #tpu.memory_space<any>>
    %16 = tpu.memref_slice %arg5[%c0_i32_5] : memref<3x!tpu.dma_semaphore, #tpu.memory_space<semaphore_mem>> -> memref<1x!tpu.dma_semaphore, #tpu.memory_space<semaphore_mem>>
    %17 = tpu.memref_squeeze %16 : memref<1x!tpu.dma_semaphore, #tpu.memory_space<semaphore_mem>> -> memref<!tpu.dma_semaphore, #tpu.memory_space<semaphore_mem>>
    tpu.wait_dma2 semaphore(%17 : memref<!tpu.dma_semaphore, #tpu.memory_space<semaphore_mem>>) src(%14 : memref<2x768xf32, #tpu.memory_space<any>>) dst(%15 : memref<2x768xf32, #tpu.memory_space<any>>)
    %c1_i32_8 = arith.constant 1 : i32
    %c0_i32_9 = arith.constant 0 : i32
    %18 = tpu.memref_slice %arg2[%1, %c0_i32_9] : memref<2x256xf32, #tpu.memory_space<any>> -> memref<2x256xf32, #tpu.memory_space<any>>
    %c768_i32_10 = arith.constant 768 : i32
    %19 = tpu.memref_slice %arg4[%1, %c768_i32_10] : memref<2x2048xf32, #tpu.memory_space<any>> -> memref<2x256xf32, #tpu.memory_space<any>>
    %20 = tpu.memref_slice %arg5[%c1_i32_8] : memref<3x!tpu.dma_semaphore, #tpu.memory_space<semaphore_mem>> -> memref<1x!tpu.dma_semaphore, #tpu.memory_space<semaphore_mem>>
    %21 = tpu.memref_squeeze %20 : memref<1x!tpu.dma_semaphore, #tpu.memory_space<semaphore_mem>> -> memref<!tpu.dma_semaphore, #tpu.memory_space<semaphore_mem>>
    tpu.wait_dma2 semaphore(%21 : memref<!tpu.dma_semaphore, #tpu.memory_space<semaphore_mem>>) src(%18 : memref<2x256xf32, #tpu.memory_space<any>>) dst(%19 : memref<2x256xf32, #tpu.memory_space<any>>)
    %c2_i32_11 = arith.constant 2 : i32
    %c0_i32_12 = arith.constant 0 : i32
    %22 = tpu.memref_slice %arg3[%1, %c0_i32_12] : memref<2x1024xf32, #tpu.memory_space<any>> -> memref<2x1024xf32, #tpu.memory_space<any>>
    %c1024_i32_13 = arith.constant 1024 : i32
    %23 = tpu.memref_slice %arg4[%1, %c1024_i32_13] : memref<2x2048xf32, #tpu.memory_space<any>> -> memref<2x1024xf32, #tpu.memory_space<any>>
    %24 = tpu.memref_slice %arg5[%c2_i32_11] : memref<3x!tpu.dma_semaphore, #tpu.memory_space<semaphore_mem>> -> memref<1x!tpu.dma_semaphore, #tpu.memory_space<semaphore_mem>>
    %25 = tpu.memref_squeeze %24 : memref<1x!tpu.dma_semaphore, #tpu.memory_space<semaphore_mem>> -> memref<!tpu.dma_semaphore, #tpu.memory_space<semaphore_mem>>
    tpu.wait_dma2 semaphore(%25 : memref<!tpu.dma_semaphore, #tpu.memory_space<semaphore_mem>>) src(%22 : memref<2x1024xf32, #tpu.memory_space<any>>) dst(%23 : memref<2x1024xf32, #tpu.memory_space<any>>)
    return
  }
}

</mosaic_0001>

<bundles_post_ra>
// kernel: tpu_custom_call.1
= control target key start
LH: loop header
LB: loop body
LE: loop exit
PB: predicated region body
PF: predicated region fallthrough
CT: control target
= control target key end

     0   :  { %s126_s21 = smov [#allocation2]   ;;  %s127_s22 = smov [#allocation3]   ;;  %s171_s0 = inlined_call_operand.hbm [shape: f32[2,768], index: 0, kind: input, shape index: {}]   ;;  %s172_s3 = inlined_call_operand.hbm [shape: f32[2,2048], index: 3, kind: output, shape index: {}]   ;;  %s173_s1 = inlined_call_operand.hbm [shape: f32[2,256], index: 1, kind: input, shape index: {}]   ;;  %s174_s2 = inlined_call_operand.hbm [shape: f32[2,1024], index: 2, kind: input, shape index: {}]  }
   0x1   :  { %s21_s14 = sshll.u32 %s171_s0, 4  ;;  %s23_s17 = sshll.u32 %s172_s3, 4  ;;  %s22_s14 = int_to_ptr.hbm [resolvable:$true] %s21_s14  ;;  %s24_s17 = int_to_ptr.hbm [resolvable:$true] %s23_s17 }
   0x2   :  { %s103_s20 = scalar_lea.hbm %s172_s3, 12  ;;  %s128_s23 = smov 0  }
   0x3   :  { %27 = dma.general %s22_s14, 192, %s24_s17, %s126_s21, %s127_s22, [#allocation4], %s128_s23, 0  }
   0x4   :  { %s39_s26 = sshll.u32 %s173_s1, 4  ;;  %s41_s27 = sshll.u32 %s103_s20, 4  ;;  %s40_s26 = int_to_ptr.hbm [resolvable:$true] %s39_s26  ;;  %s42_s27 = int_to_ptr.hbm [resolvable:$true] %s41_s27 }
   0x5   :  { %s129_s0 = smov [#allocation2 + $0x1]   ;;  %s130_s28 = smov [#allocation5]  }
   0x6   :  { %45 = dma.general %s40_s26, 64, %s42_s27, %s129_s0, %s130_s28, [#allocation6], %s128_s23, 0  }
   0x7   :  { %s109_s4 = scalar_lea.hbm %s172_s3, 16  ;;  %s57_s7 = sshll.u32 %s174_s2, 4  ;;  %s58_s7 = int_to_ptr.hbm [resolvable:$true] %s57_s7 }
   0x8   :  { %s59_s8 = sshll.u32 %s109_s4, 4  ;;  %s131_s9 = smov [#allocation2 + $0x2]   ;;  %s60_s8 = int_to_ptr.hbm [resolvable:$true] %s59_s8 }
   0x9   :  { %s132_s10 = smov [#allocation7]  }
   0xa   :  { %63 = dma.general %s58_s7, 256, %s60_s8, %s131_s9, %s132_s10, [#allocation8], %s128_s23, 0  }
   0xb   :  { %120 = dma.done.wait [#allocation2], 192 }
   0xc   :  { %121 = vsyncadd [#allocation2], 4294967104 }
   0xd   :  { %122 = dma.done.wait [#allocation2 + $0x1], 64 }
   0xe   :  { %123 = vsyncadd [#allocation2 + $0x1], 4294967232 }
   0xf   :  { %124 = dma.done.wait [#allocation2 + $0x2], 256 }
  0x10   :  { %125 = vsyncadd [#allocation2 + $0x2], 4294967040 }
  0x11   :  { %74 = vsyncmov [#allocation2] }
  0x14   :  { %s75_s1 = vpop.sfrf %74 }
  0x15   :  { %p110_p0 = scmp.ne.s32.totalorder %s75_s1, 0 }
  0x17   :  { %79 = shalt.err (%p110_p0)  }
  0x18   :  { %81 = vsyncmov [#allocation2 + $0x1] }
  0x1b   :  { %s82_s3 = vpop.sfrf %81 }
  0x1c   :  { %p111_p1 = scmp.ne.s32.totalorder %s82_s3, 0 }
  0x1e   :  { %86 = shalt.err (%p111_p1)  }
  0x1f   :  { %88 = vsyncmov [#allocation2 + $0x2] }
  0x22   :  { %s89_s2 = vpop.sfrf %88 }
  0x23   :  { %p112_p2 = scmp.ne.s32.totalorder %s89_s2, 0 }
  0x25   :  { %93 = shalt.err (%p112_p2)  }

</bundles_post_ra>
